<compile_context>
chip_gen: v7x
topology: tpu7x:2x2x1
jax: 0.10.0
libtpu: 0.0.40
codegen_flags: <defaults>
</compile_context>

<pallas_src>
import jax
import jax.numpy as jnp
from jax.experimental import pallas as pl
from jax.experimental.pallas import tpu as pltpu


def lstm_kernel(tmax_ref, x_ref, len_ref, h0_ref, c0_ref,
                wih_ref, whh_ref, b_ref, wout_ref, bout_ref,
                out_ref, gx_ref, h_scr, c_scr):
    """Whole forward pass in one invocation.

    tmax_ref : (1,)      int32 SMEM  max(lengths)  (scalar prefetch)
    x_ref    : (T*B, V)  bf16        time-major inputs, row = t*B + b
    len_ref  : (B, 1)    int32       sequence lengths
    h0/c0    : (B, H)    f32         initial hidden / cell state
    wih      : (V, 4H)   bf16        W_ih^T  (gate order i, f, g, o)
    whh      : (H, 4H)   bf16        W_hh^T
    b        : (1, 4H)   f32         b_ih + b_hh
    wout     : (H, O)    bf16        W_out^T
    bout     : (1, O)    f32
    out_ref  : (B, O)    f32         log-softmax output
    gx_ref   : (T*B, 4H) f32 scratch hoisted input projection (+ bias)
    h_scr/c_scr : (B, H) f32 scratch recurrent state
    """
    B, H = h0_ref.shape
    t_max = tmax_ref[0]

    # ---- Hoisted input projection: one MXU op covers every timestep. -------
    gx_ref[...] = (jnp.dot(x_ref[...], wih_ref[...],
                           preferred_element_type=jnp.float32)
                   + b_ref[...])                         # (T*B, 4H) f32

    # ---- Recurrent state init + loop-invariant values (hoisted). -----------
    h_scr[...] = h0_ref[...]
    c_scr[...] = c0_ref[...]
    whh = whh_ref[...]                                   # (H, 4H) bf16, resident
    lens = jnp.broadcast_to(len_ref[...], (B, H))        # (B, H) int32

    # ---- Recurrence: bounded by max(lengths); padded tail never executed. --
    @pl.loop(0, t_max)
    def _(t):
        h_prev = h_scr[...]
        c_prev = c_scr[...]
        off = pl.multiple_of(t * B, B)
        g_x = gx_ref[pl.ds(off, B), :]                   # (B, 4H) precomputed
        gates = g_x + jnp.dot(h_prev.astype(jnp.bfloat16), whh,
                              preferred_element_type=jnp.float32)

        i_g = jax.nn.sigmoid(gates[:, 0:H])
        f_g = jax.nn.sigmoid(gates[:, H:2 * H])
        g_g = jnp.tanh(gates[:, 2 * H:3 * H])
        o_g = jax.nn.sigmoid(gates[:, 3 * H:4 * H])

        c_new = f_g * c_prev + i_g * g_g
        h_new = o_g * jnp.tanh(c_new)

        # packed-sequence semantics: only samples with length > t update
        active = t < lens                                # (B, H) bool
        h_scr[...] = jnp.where(active, h_new, h_prev)
        c_scr[...] = jnp.where(active, c_new, c_prev)

    # ---- Classifier head: Linear + LogSoftmax (written once). --------------
    logits = (jnp.dot(h_scr[...].astype(jnp.bfloat16), wout_ref[...],
                      preferred_element_type=jnp.float32)
              + bout_ref[...])                           # (B, O) f32
    m = jnp.max(logits, axis=-1, keepdims=True)
    shifted = logits - m
    lse = jnp.log(jnp.sum(jnp.exp(shifted), axis=-1, keepdims=True))
    out_ref[...] = shifted - lse


def lstm_classifier_forward(x, lengths, h0, c0,
                            w_ih, w_hh, b_ih, b_hh, w_out, b_out):
    """x: (B, T, V) float32, lengths: (B,) int32. Returns (B, O) log-probs."""
    B, T, V = x.shape
    H = w_hh.shape[1]            # w_hh: (4H, H)
    O = w_out.shape[0]           # w_out: (O, H)

    # Time-major 2-D layout: row t*B + b. One tiny wrapper pass; inside the
    # kernel the per-step access is a contiguous dynamic sublane slice.
    x_tm = jnp.transpose(x, (1, 0, 2)).reshape(T * B, V).astype(jnp.bfloat16)

    wih_t = w_ih.T.astype(jnp.bfloat16)                       # (V, 4H)
    whh_t = w_hh.T.astype(jnp.bfloat16)                       # (H, 4H)
    wout_t = w_out.T.astype(jnp.bfloat16)                     # (H, O)
    b_all = (b_ih + b_hh).reshape(1, 4 * H).astype(jnp.float32)
    bout2 = b_out.reshape(1, O).astype(jnp.float32)
    lens2 = lengths.reshape(B, 1).astype(jnp.int32)
    t_max = jnp.max(lengths).astype(jnp.int32).reshape(1)     # SMEM scalar
    h0b = jnp.broadcast_to(h0.reshape(1, H), (B, H)).astype(jnp.float32)
    c0b = jnp.broadcast_to(c0.reshape(1, H), (B, H)).astype(jnp.float32)

    full2 = lambda i, tmax: (0, 0)    # everything is a full-array block

    return pl.pallas_call(
        lstm_kernel,
        out_shape=jax.ShapeDtypeStruct((B, O), jnp.float32),
        grid_spec=pltpu.PrefetchScalarGridSpec(
            num_scalar_prefetch=1,              # t_max -> SMEM
            grid=(1,),                          # single invocation
            in_specs=[
                pl.BlockSpec((T * B, V), full2),      # x (time-major)
                pl.BlockSpec((B, 1), full2),          # lengths
                pl.BlockSpec((B, H), full2),          # h0
                pl.BlockSpec((B, H), full2),          # c0
                pl.BlockSpec((V, 4 * H), full2),      # W_ih^T
                pl.BlockSpec((H, 4 * H), full2),      # W_hh^T
                pl.BlockSpec((1, 4 * H), full2),      # b_ih + b_hh
                pl.BlockSpec((H, O), full2),          # W_out^T
                pl.BlockSpec((1, O), full2),          # b_out
            ],
            out_specs=pl.BlockSpec((B, O), full2),
            scratch_shapes=[
                pltpu.VMEM((T * B, 4 * H), jnp.float32),   # hoisted x-projection
                pltpu.VMEM((B, H), jnp.float32),           # h state
                pltpu.VMEM((B, H), jnp.float32),           # c state
            ],
        ),
        compiler_params=pltpu.CompilerParams(
            dimension_semantics=("arbitrary",)),
    )(t_max, x_tm, lens2, h0b, c0b, wih_t, whh_t, b_all, wout_t, bout2)


def reference_forward(x, lengths, h0, c0,
                      w_ih, w_hh, b_ih, b_hh, w_out, b_out,
                      matmul_dtype=jnp.float32):
    """Pure-JAX reference. matmul_dtype=bfloat16 mirrors the kernel's MXU
    operand precision (f32 accumulation / gate math / state)."""
    B, T, V = x.shape
    H = w_hh.shape[1]
    wih_t = w_ih.T.astype(matmul_dtype)
    whh_t = w_hh.T.astype(matmul_dtype)
    wout_t = w_out.T.astype(matmul_dtype)
    b = (b_ih + b_hh).reshape(1, 4 * H).astype(jnp.float32)
    h = jnp.broadcast_to(h0.reshape(1, H), (B, H)).astype(jnp.float32)
    c = jnp.broadcast_to(c0.reshape(1, H), (B, H)).astype(jnp.float32)
    for t in range(T):
        gates = (jnp.dot(x[:, t, :].astype(matmul_dtype), wih_t,
                         preferred_element_type=jnp.float32)
                 + jnp.dot(h.astype(matmul_dtype), whh_t,
                           preferred_element_type=jnp.float32)
                 + b)
        i = jax.nn.sigmoid(gates[:, :H])
        f = jax.nn.sigmoid(gates[:, H:2 * H])
        g = jnp.tanh(gates[:, 2 * H:3 * H])
        o = jax.nn.sigmoid(gates[:, 3 * H:])
        c_new = f * c + i * g
        h_new = o * jnp.tanh(c_new)
        mask = (t < lengths).reshape(B, 1)
        h = jnp.where(mask, h_new, h)
        c = jnp.where(mask, c_new, c)
    logits = (jnp.dot(h.astype(matmul_dtype), wout_t,
                      preferred_element_type=jnp.float32)
              + b_out.reshape(1, -1).astype(jnp.float32))
    return jax.nn.log_softmax(logits, axis=-1)


if __name__ == "__main__":
    # Small shapes implied by the module: (batch, seq, vocab_size) inputs,
    # hidden_dim and output_size for the classifier head.
    B, T = 4, 8
    vocab_size, hidden_dim, output_size = 16, 32, 8

    key = jax.random.PRNGKey(0)
    ks = jax.random.split(key, 9)

    # Deterministic parameter init (PyTorch-style U(-1/sqrt(H), 1/sqrt(H))).
    bound = 1.0 / jnp.sqrt(jnp.float32(hidden_dim))
    u = lambda k, shape: jax.random.uniform(k, shape, jnp.float32, -bound, bound)
    w_ih = u(ks[0], (4 * hidden_dim, vocab_size))
    w_hh = u(ks[1], (4 * hidden_dim, hidden_dim))
    b_ih = u(ks[2], (4 * hidden_dim,))
    b_hh = u(ks[3], (4 * hidden_dim,))
    w_out = u(ks[4], (output_size, hidden_dim))
    b_out = u(ks[5], (output_size,))

    # init_hidden(): randn(1,1,H) — drawn deterministically here and broadcast
    # across the batch (PyTorch code only runs with batch=1 as written).
    h0 = jax.random.normal(ks[6], (1, 1, hidden_dim), jnp.float32)
    c0 = jax.random.normal(ks[7], (1, 1, hidden_dim), jnp.float32)

    # Padded batch + descending lengths (pack_padded_sequence requirement).
    x = jax.random.normal(ks[8], (B, T, vocab_size), jnp.float32)
    lengths = jnp.array([8, 5, 3, 2], dtype=jnp.int32)

    out = lstm_classifier_forward(x, lengths, h0, c0,
                                  w_ih, w_hh, b_ih, b_hh, w_out, b_out)
    out = jax.block_until_ready(out)
    assert out.shape == (B, output_size)

    # Primary check: reference with identical bf16 MXU-operand precision.
    ref_bf16 = reference_forward(x, lengths, h0, c0,
                                 w_ih, w_hh, b_ih, b_hh, w_out, b_out,
                                 matmul_dtype=jnp.bfloat16)
    assert jnp.max(jnp.abs(out - ref_bf16)) < 2e-3, "mismatch vs bf16 reference"

    # Sanity check: full-f32 reference (bf16 MXU operands cost a little drift).
    ref_f32 = reference_forward(x, lengths, h0, c0,
                                w_ih, w_hh, b_ih, b_hh, w_out, b_out,
                                matmul_dtype=jnp.float32)
    assert jnp.max(jnp.abs(out - ref_f32)) < 5e-2, "mismatch vs f32 reference"

    print("KERNEL_OK")
</pallas_src>

<mosaic_0001>
module attributes {stable_mosaic.version = 11 : i64} {
  func.func @lstm_kernel(%arg0: i32, %arg1: memref<1xi32, #tpu.memory_space<smem>>, %arg2: memref<32x16xbf16, #tpu.memory_space<vmem>>, %arg3: memref<4x1xi32, #tpu.memory_space<vmem>>, %arg4: memref<4x32xf32, #tpu.memory_space<vmem>>, %arg5: memref<4x32xf32, #tpu.memory_space<vmem>>, %arg6: memref<16x128xbf16, #tpu.memory_space<vmem>>, %arg7: memref<32x128xbf16, #tpu.memory_space<vmem>>, %arg8: memref<1x128xf32, #tpu.memory_space<vmem>>, %arg9: memref<32x8xbf16, #tpu.memory_space<vmem>>, %arg10: memref<1x8xf32, #tpu.memory_space<vmem>>, %arg11: memref<4x8xf32, #tpu.memory_space<vmem>>, %arg12: memref<32x128xf32, #tpu.memory_space<vmem>>, %arg13: memref<4x32xf32, #tpu.memory_space<vmem>>, %arg14: memref<4x32xf32, #tpu.memory_space<vmem>>) attributes {dimension_semantics = [#tpu.dimension_semantics<arbitrary>], iteration_bounds = array<i64: 1>, scalar_prefetch = 1 : i64, scratch_operands = 3 : i64, tpu.core_type = #tpu.core_type<tc>, window_params = [{pipeline_mode = #tpu.pipeline_mode<synchronous>, transform_indices = @transform_0, window_bounds = array<i64: 32, 16>}, {pipeline_mode = #tpu.pipeline_mode<synchronous>, transform_indices = @transform_1, window_bounds = array<i64: 4, 1>}, {pipeline_mode = #tpu.pipeline_mode<synchronous>, transform_indices = @transform_2, window_bounds = array<i64: 4, 32>}, {pipeline_mode = #tpu.pipeline_mode<synchronous>, transform_indices = @transform_3, window_bounds = array<i64: 4, 32>}, {pipeline_mode = #tpu.pipeline_mode<synchronous>, transform_indices = @transform_4, window_bounds = array<i64: 16, 128>}, {pipeline_mode = #tpu.pipeline_mode<synchronous>, transform_indices = @transform_5, window_bounds = array<i64: 32, 128>}, {pipeline_mode = #tpu.pipeline_mode<synchronous>, transform_indices = @transform_6, window_bounds = array<i64: 1, 128>}, {pipeline_mode = #tpu.pipeline_mode<synchronous>, transform_indices = @transform_7, window_bounds = array<i64: 32, 8>}, {pipeline_mode = #tpu.pipeline_mode<synchronous>, transform_indices = @transform_8, window_bounds = array<i64: 1, 8>}, {pipeline_mode = #tpu.pipeline_mode<synchronous>, transform_indices = @transform_9, window_bounds = array<i64: 4, 8>}]} {
    %c0 = arith.constant 0 : index
    %0 = memref.load %arg1[%c0] : memref<1xi32, #tpu.memory_space<smem>>
    %c0_0 = arith.constant 0 : index
    %c0_1 = arith.constant 0 : index
    %1 = vector.load %arg2[%c0_0, %c0_1] : memref<32x16xbf16, #tpu.memory_space<vmem>>, vector<32x16xbf16>
    %c0_2 = arith.constant 0 : index
    %c0_3 = arith.constant 0 : index
    %2 = vector.load %arg6[%c0_2, %c0_3] : memref<16x128xbf16, #tpu.memory_space<vmem>>, vector<16x128xbf16>
    %cst = arith.constant dense<0.000000e+00> : vector<32x128xf32>
    %3 = tpu.matmul %1, %2, %cst {dimension_numbers = #tpu.dot_dimension_numbers<[1], [0], [0], [1], [0, 0, 1, 1], [], []>} : vector<32x16xbf16>, vector<16x128xbf16>, vector<32x128xf32> -> vector<32x128xf32>
    %c0_4 = arith.constant 0 : index
    %c0_5 = arith.constant 0 : index
    %4 = vector.load %arg8[%c0_4, %c0_5] : memref<1x128xf32, #tpu.memory_space<vmem>>, vector<1x128xf32>
    %5 = vector.broadcast %4 : vector<1x128xf32> to vector<32x128xf32>
    %6 = arith.addf %3, %5 : vector<32x128xf32>
    %c0_6 = arith.constant 0 : index
    %c0_7 = arith.constant 0 : index
    %7 = vector.load %arg12[%c0_6, %c0_7] : memref<32x128xf32, #tpu.memory_space<vmem>>, vector<32x128xf32>
    tpu.vector_store %arg12[%c0_6, %c0_7], %6 {strides = array<i32>} : memref<32x128xf32, #tpu.memory_space<vmem>>, vector<32x128xf32>,
    %c0_8 = arith.constant 0 : index
    %c0_9 = arith.constant 0 : index
    %8 = vector.load %arg4[%c0_8, %c0_9] : memref<4x32xf32, #tpu.memory_space<vmem>>, vector<4x32xf32>
    %c0_10 = arith.constant 0 : index
    %c0_11 = arith.constant 0 : index
    %9 = vector.load %arg13[%c0_10, %c0_11] : memref<4x32xf32, #tpu.memory_space<vmem>>, vector<4x32xf32>
    tpu.vector_store %arg13[%c0_10, %c0_11], %8 {strides = array<i32>} : memref<4x32xf32, #tpu.memory_space<vmem>>, vector<4x32xf32>,
    %c0_12 = arith.constant 0 : index
    %c0_13 = arith.constant 0 : index
    %10 = vector.load %arg5[%c0_12, %c0_13] : memref<4x32xf32, #tpu.memory_space<vmem>>, vector<4x32xf32>
    %c0_14 = arith.constant 0 : index
    %c0_15 = arith.constant 0 : index
    %11 = vector.load %arg14[%c0_14, %c0_15] : memref<4x32xf32, #tpu.memory_space<vmem>>, vector<4x32xf32>
    tpu.vector_store %arg14[%c0_14, %c0_15], %10 {strides = array<i32>} : memref<4x32xf32, #tpu.memory_space<vmem>>, vector<4x32xf32>,
    %c0_16 = arith.constant 0 : index
    %c0_17 = arith.constant 0 : index
    %12 = vector.load %arg7[%c0_16, %c0_17] : memref<32x128xbf16, #tpu.memory_space<vmem>>, vector<32x128xbf16>
    %c0_18 = arith.constant 0 : index
    %c0_19 = arith.constant 0 : index
    %13 = vector.load %arg3[%c0_18, %c0_19] : memref<4x1xi32, #tpu.memory_space<vmem>>, vector<4x1xi32>
    %14 = vector.shape_cast %13 : vector<4x1xi32> to vector<4x1xi32>
    %15 = vector.broadcast %14 : vector<4x1xi32> to vector<4x32xi32>
    %c0_i32 = arith.constant 0 : i32
    %16 = arith.subi %0, %c0_i32 : i32
    %c1_i32 = arith.constant 1 : i32
    %c1_i32_20 = arith.constant 1 : i32
    %17 = arith.subi %c1_i32, %c1_i32_20 : i32
    %18 = arith.addi %16, %17 : i32
    %c1_i32_21 = arith.constant 1 : i32
    %19 = arith.divsi %18, %c1_i32_21 : i32
    %c1_i32_22 = arith.constant 1 : i32
    %c0_i32_23 = arith.constant 0 : i32
    %c0_i32_24 = arith.constant 0 : i32
    %20 = arith.subi %19, %c0_i32_24 : i32
    %21 = arith.addi %c0_i32_24, %20 : i32
    %c1_i32_25 = arith.constant 1 : i32
    scf.for %arg15 = %c0_i32_24 to %21 step %c1_i32_25  : i32 {
      %40 = arith.muli %arg15, %c1_i32_22 : i32
      %41 = arith.addi %c0_i32_23, %40 : i32
      %c0_37 = arith.constant 0 : index
      %c0_38 = arith.constant 0 : index
      %42 = vector.load %arg13[%c0_37, %c0_38] : memref<4x32xf32, #tpu.memory_space<vmem>>, vector<4x32xf32>
      %c0_39 = arith.constant 0 : index
      %c0_40 = arith.constant 0 : index
      %43 = vector.load %arg14[%c0_39, %c0_40] : memref<4x32xf32, #tpu.memory_space<vmem>>, vector<4x32xf32>
      %c4_i32 = arith.constant 4 : i32
      %44 = arith.muli %41, %c4_i32 : i32
      %45 = tpu.assume_multiple %44, 4 : i32
      %46 = arith.index_cast %45 : i32 to index
      %c0_41 = arith.constant 0 : index
      %47 = vector.load %arg12[%46, %c0_41] : memref<32x128xf32, #tpu.memory_space<vmem>>, vector<4x128xf32>
      %48 = arith.truncf %42 : vector<4x32xf32> to vector<4x32xbf16>
      %cst_42 = arith.constant dense<0.000000e+00> : vector<4x128xf32>
      %49 = tpu.matmul %48, %12, %cst_42 {dimension_numbers = #tpu.dot_dimension_numbers<[1], [0], [0], [1], [0, 0, 1, 1], [], []>} : vector<4x32xbf16>, vector<32x128xbf16>, vector<4x128xf32> -> vector<4x128xf32>
      %50 = arith.addf %47, %49 : vector<4x128xf32>
      %51 = vector.extract_strided_slice %50 {offsets = [0, 0], sizes = [4, 32], strides = [1, 1]} : vector<4x128xf32> to vector<4x32xf32>
      %52 = arith.negf %51 : vector<4x32xf32>
      %53 = math.exp %52 : vector<4x32xf32>
      %cst_43 = arith.constant 1.000000e+00 : f32
      %54 = vector.broadcast %cst_43 : f32 to vector<4x32xf32>
      %55 = arith.addf %54, %53 : vector<4x32xf32>
      %56 = arith.divf %54, %55 : vector<4x32xf32>
      %57 = vector.extract_strided_slice %50 {offsets = [0, 32], sizes = [4, 32], strides = [1, 1]} : vector<4x128xf32> to vector<4x32xf32>
      %58 = arith.negf %57 : vector<4x32xf32>
      %59 = math.exp %58 : vector<4x32xf32>
      %cst_44 = arith.constant 1.000000e+00 : f32
      %60 = vector.broadcast %cst_44 : f32 to vector<4x32xf32>
      %61 = arith.addf %60, %59 : vector<4x32xf32>
      %62 = arith.divf %60, %61 : vector<4x32xf32>
      %63 = vector.extract_strided_slice %50 {offsets = [0, 64], sizes = [4, 32], strides = [1, 1]} : vector<4x128xf32> to vector<4x32xf32>
      %64 = math.tanh %63 : vector<4x32xf32>
      %65 = vector.extract_strided_slice %50 {offsets = [0, 96], sizes = [4, 32], strides = [1, 1]} : vector<4x128xf32> to vector<4x32xf32>
      %66 = arith.negf %65 : vector<4x32xf32>
      %67 = math.exp %66 : vector<4x32xf32>
      %cst_45 = arith.constant 1.000000e+00 : f32
      %68 = vector.broadcast %cst_45 : f32 to vector<4x32xf32>
      %69 = arith.addf %68, %67 : vector<4x32xf32>
      %70 = arith.divf %68, %69 : vector<4x32xf32>
      %71 = arith.mulf %62, %43 : vector<4x32xf32>
      %72 = arith.mulf %56, %64 : vector<4x32xf32>
      %73 = arith.addf %71, %72 : vector<4x32xf32>
      %74 = math.tanh %73 : vector<4x32xf32>
      %75 = arith.mulf %70, %74 : vector<4x32xf32>
      %76 = vector.broadcast %41 : i32 to vector<4x32xi32>
      %77 = arith.cmpi slt, %76, %15 : vector<4x32xi32>
      %78 = arith.select %77, %75, %42 : vector<4x32xi1>, vector<4x32xf32>
      %c0_46 = arith.constant 0 : index
      %c0_47 = arith.constant 0 : index
      %79 = vector.load %arg13[%c0_46, %c0_47] : memref<4x32xf32, #tpu.memory_space<vmem>>, vector<4x32xf32>
      tpu.vector_store %arg13[%c0_46, %c0_47], %78 {strides = array<i32>} : memref<4x32xf32, #tpu.memory_space<vmem>>, vector<4x32xf32>,
      %80 = arith.select %77, %73, %43 : vector<4x32xi1>, vector<4x32xf32>
      %c0_48 = arith.constant 0 : index
      %c0_49 = arith.constant 0 : index
      %81 = vector.load %arg14[%c0_48, %c0_49] : memref<4x32xf32, #tpu.memory_space<vmem>>, vector<4x32xf32>
      tpu.vector_store %arg14[%c0_48, %c0_49], %80 {strides = array<i32>} : memref<4x32xf32, #tpu.memory_space<vmem>>, vector<4x32xf32>,
    }
    %c0_26 = arith.constant 0 : index
    %c0_27 = arith.constant 0 : index
    %22 = vector.load %arg13[%c0_26, %c0_27] : memref<4x32xf32, #tpu.memory_space<vmem>>, vector<4x32xf32>
    %23 = arith.truncf %22 : vector<4x32xf32> to vector<4x32xbf16>
    %c0_28 = arith.constant 0 : index
    %c0_29 = arith.constant 0 : index
    %24 = vector.load %arg9[%c0_28, %c0_29] : memref<32x8xbf16, #tpu.memory_space<vmem>>, vector<32x8xbf16>
    %cst_30 = arith.constant dense<0.000000e+00> : vector<4x8xf32>
    %25 = tpu.matmul %23, %24, %cst_30 {dimension_numbers = #tpu.dot_dimension_numbers<[1], [0], [0], [1], [0, 0, 1, 1], [], []>} : vector<4x32xbf16>, vector<32x8xbf16>, vector<4x8xf32> -> vector<4x8xf32>
    %c0_31 = arith.constant 0 : index
    %c0_32 = arith.constant 0 : index
    %26 = vector.load %arg10[%c0_31, %c0_32] : memref<1x8xf32, #tpu.memory_space<vmem>>, vector<1x8xf32>
    %27 = vector.broadcast %26 : vector<1x8xf32> to vector<4x8xf32>
    %28 = arith.addf %25, %27 : vector<4x8xf32>
    %cst_33 = arith.constant dense<0xFF800000> : vector<4xf32>
    %29 = vector.multi_reduction <maximumf>, %28, %cst_33 [1] : vector<4x8xf32> to vector<4xf32>
    %30 = vector.shape_cast %29 : vector<4xf32> to vector<4x1xf32>
    %31 = vector.broadcast %30 : vector<4x1xf32> to vector<4x8xf32>
    %32 = arith.subf %28, %31 : vector<4x8xf32>
    %33 = math.exp %32 : vector<4x8xf32>
    %cst_34 = arith.constant dense<0.000000e+00> : vector<4xf32>
    %34 = vector.multi_reduction <add>, %33, %cst_34 [1] : vector<4x8xf32> to vector<4xf32>
    %35 = vector.shape_cast %34 : vector<4xf32> to vector<4x1xf32>
    %36 = math.log %35 : vector<4x1xf32>
    %37 = vector.broadcast %36 : vector<4x1xf32> to vector<4x8xf32>
    %38 = arith.subf %32, %37 : vector<4x8xf32>
    %c0_35 = arith.constant 0 : index
    %c0_36 = arith.constant 0 : index
    %39 = vector.load %arg11[%c0_35, %c0_36] : memref<4x8xf32, #tpu.memory_space<vmem>>, vector<4x8xf32>
    tpu.vector_store %arg11[%c0_35, %c0_36], %38 {strides = array<i32>} : memref<4x8xf32, #tpu.memory_space<vmem>>, vector<4x8xf32>,
    return
  }
  func.func @transform_0(%arg0: i32, %arg1: memref<1xi32, #tpu.memory_space<smem>>) -> (i32, i32) {
    %c0_i32 = arith.constant 0 : i32
    %c0_i32_0 = arith.constant 0 : i32
    %c0_i32_1 = arith.constant 0 : i32
    return %c0_i32, %c0_i32_0 : i32, i32
  }
  func.func @transform_1(%arg0: i32, %arg1: memref<1xi32, #tpu.memory_space<smem>>) -> (i32, i32) {
    %c0_i32 = arith.constant 0 : i32
    %c0_i32_0 = arith.constant 0 : i32
    %c0_i32_1 = arith.constant 0 : i32
    return %c0_i32, %c0_i32_0 : i32, i32
  }
  func.func @transform_2(%arg0: i32, %arg1: memref<1xi32, #tpu.memory_space<smem>>) -> (i32, i32) {
    %c0_i32 = arith.constant 0 : i32
    %c0_i32_0 = arith.constant 0 : i32
    %c0_i32_1 = arith.constant 0 : i32
    return %c0_i32, %c0_i32_0 : i32, i32
  }
  func.func @transform_3(%arg0: i32, %arg1: memref<1xi32, #tpu.memory_space<smem>>) -> (i32, i32) {
    %c0_i32 = arith.constant 0 : i32
    %c0_i32_0 = arith.constant 0 : i32
    %c0_i32_1 = arith.constant 0 : i32
    return %c0_i32, %c0_i32_0 : i32, i32
  }
  func.func @transform_4(%arg0: i32, %arg1: memref<1xi32, #tpu.memory_space<smem>>) -> (i32, i32) {
    %c0_i32 = arith.constant 0 : i32
    %c0_i32_0 = arith.constant 0 : i32
    %c0_i32_1 = arith.constant 0 : i32
    return %c0_i32, %c0_i32_0 : i32, i32
  }
  func.func @transform_5(%arg0: i32, %arg1: memref<1xi32, #tpu.memory_space<smem>>) -> (i32, i32) {
    %c0_i32 = arith.constant 0 : i32
    %c0_i32_0 = arith.constant 0 : i32
    %c0_i32_1 = arith.constant 0 : i32
    return %c0_i32, %c0_i32_0 : i32, i32
  }
  func.func @transform_6(%arg0: i32, %arg1: memref<1xi32, #tpu.memory_space<smem>>) -> (i32, i32) {
    %c0_i32 = arith.constant 0 : i32
    %c0_i32_0 = arith.constant 0 : i32
    %c0_i32_1 = arith.constant 0 : i32
    return %c0_i32, %c0_i32_0 : i32, i32
  }
  func.func @transform_7(%arg0: i32, %arg1: memref<1xi32, #tpu.memory_space<smem>>) -> (i32, i32) {
    %c0_i32 = arith.constant 0 : i32
    %c0_i32_0 = arith.constant 0 : i32
    %c0_i32_1 = arith.constant 0 : i32
    return %c0_i32, %c0_i32_0 : i32, i32
  }
  func.func @transform_8(%arg0: i32, %arg1: memref<1xi32, #tpu.memory_space<smem>>) -> (i32, i32) {
    %c0_i32 = arith.constant 0 : i32
    %c0_i32_0 = arith.constant 0 : i32
    %c0_i32_1 = arith.constant 0 : i32
    return %c0_i32, %c0_i32_0 : i32, i32
  }
  func.func @transform_9(%arg0: i32, %arg1: memref<1xi32, #tpu.memory_space<smem>>) -> (i32, i32) {
    %c0_i32 = arith.constant 0 : i32
    %c0_i32_0 = arith.constant 0 : i32
    %c0_i32_1 = arith.constant 0 : i32
    return %c0_i32, %c0_i32_0 : i32, i32
  }
}

</mosaic_0001>

<bundles_post_ra>
// kernel: tpu_custom_call.1
= control target key start
LH: loop header
LB: loop body
LE: loop exit
PB: predicated region body
PF: predicated region fallthrough
CT: control target
= control target key end

     0   :  { %16 = vsyncpa [#allocation8], 0  ;;  %vm66_vm0 = vcmask 130048   ;;  %v472_v3 = vmov 0   ;;  %vm127_vm1 = vcmask 257024   ;;  %s628_s0 = inlined_call_operand.<no memory space> [shape: s32[1], index: 0, kind: input, shape index: {}]   ;;  %s629_s1 = inlined_call_operand.vmem [shape: bf16[32,16], index: 1, kind: input, shape index: {}]   ;;  %s630_s2 = inlined_call_operand.vmem [shape: s32[4,1], index: 2, kind: input, shape index: {}]   ;;  %s631_s3 = inlined_call_operand.vmem [shape: f32[4,32], index: 3, kind: input, shape index: {}]   ;;  %s632_s4 = inlined_call_operand.vmem [shape: f32[4,32], index: 4, kind: input, shape index: {}]   ;;  %s633_s5 = inlined_call_operand.vmem [shape: bf16[16,128], index: 5, kind: input, shape index: {}]   ;;  %s634_s6 = inlined_call_operand.vmem [shape: bf16[32,128], index: 6, kind: input, shape index: {}]   ;;  %s635_s7 = inlined_call_operand.vmem [shape: f32[1,128], index: 7, kind: input, shape index: {}]   ;;  %s636_s8 = inlined_call_operand.vmem [shape: bf16[32,8], index: 8, kind: input, shape index: {}]   ;;  %s637_s9 = inlined_call_operand.vmem [shape: f32[1,8], index: 9, kind: input, shape index: {}]   ;;  %s638_s10 = inlined_call_operand.hbm [shape: f32[4,8], index: 10, kind: output, shape index: {}]  }
   0x1   :  { %v423_v0 = vld [vmem:[%s633_s5] sm:$0xff]   ;;  %v425_v2 = vld [vmem:[%s629_s1 + $0x8] sm:$0xff]   ;;  %422 = vset.pattern.permute.xlu0 %v472_v3  ;;  %p364_p0 = scmp.le.s32.totalorder %s628_s0, 0 }
   0x2   :  { %v424_v1 = vld [vmem:[%s629_s1] sm:$0xff]   ;;  %383 = vmatprep.subr.bf16.mxu0 %v423_v0  ;;  %v569_v9 = vld [vmem:[%s634_s6 + $0x8] sm:$0xf]  ;;  %v574_v10 = vld [vmem:[%s634_s6 + $0xc] sm:$0xf]  ;;  %s584_s11 = smov (!%p364_p0), 0  }
   0x3   :  { %v135_v4 = vld [vmem:[%s630_s2] sm:$0xf]  ;;  %384 = vmatpush3.bf16.msra.mxu0 %v423_v0  ;;  %385 = vmatprep.mubr.msk.bf16.mxu0 %vm66_vm0, %v424_v1  ;;  %v564_v8 = vld [vmem:[%s634_s6 + $0x4] sm:$0xf] }
   0x4   :  { %137 = vperm.xlu0 %422, %v135_v4   ;;  %v126_v5 = vld [vmem:[%s631_s3] sm:$0xf] }
   0x5   :  { %v129_v6 = vld [vmem:[%s632_s4] sm:$0xf]  ;;  %128 = vst.msk [vmem:[#allocation3] sm:$0xf] %vm127_vm1, %v126_v5 }
   0x6   :  { %386 = vmatmul.mubr.msk.bf16.vlgmr.msra.gmra.mrb[0].mxu0 %vm66_vm0, %v425_v2  ;;  %130 = vst.msk [vmem:[#allocation4] sm:$0xf] %vm127_vm1, %v129_v6  ;;  %v559_v7 = vld [vmem:[%s634_s6] sm:$0xf] }
   0x7   :  { %v358_v12 = vld [vmem:[%s635_s7] ss:$0 sm:$0xff] }
  0x83   :  { %v576_v11 = vpop.permute.xlu0 %137 }
  0xd9   :  { %v387_v13 = vpop.f32.mrb[0].mxu0  ;;  %355 = sbr.rel (%p364_p0) target bundleno = 937 (0x3a9), region = 58 }
  0xda   :  { %v116_v14 = vadd.f32 %v387_v13, %v358_v12  ;;  %v107_v15 = vpop.f32.mrb[1].mxu0 }
  0xdb   :  { %v108_v16 = vadd.f32 %v358_v12, %v107_v15  ;;  %v388_v17 = vpop.f32.mrb[2].mxu0 }
  0xdc   :  { %124 = vst [vmem:[#allocation2 + $0x10] sm:$0xff] %v116_v14  ;;  %v119_v18 = vadd.f32 %v388_v17, %v358_v12  ;;  %v110_v19 = vpop.f32.mrb[3].mxu0 }
  0xdd   :  { %122 = vst [vmem:[#allocation2] sm:$0xff] %v108_v16  ;;  %v111_v20 = vadd.f32 %v358_v12, %v110_v19 }
  0xde   :  { %125 = vst [vmem:[#allocation2 + $0x18] sm:$0xff] %v119_v18 }
  0xdf   :  { %123 = vst [vmem:[#allocation2 + $0x8] sm:$0xff] %v111_v20 }
  0xe0 LB: > { %v366_v21 = vcombine.low %v559_v7, %v564_v8  ;;  %v473_v22 = vmov 0.0   ;;  %vm474_vm2 = vmmov 0   ;;  %v367_v23 = vcombine.low %v569_v9, %v574_v10  ;;  %v145_v24 = vld [vmem:[#allocation3] sm:$0xf]  ;;  %s365_s7 = sshll.u32 %s470_s11, 2  ;;  %s475_s13 = smov 64   ;;  %s470_s11 = sphi %s584_s11, %s142_s11  }
  0xe1   : > { %389 = vmatprep.subr.bf16.mxu0 %v473_v22  ;;  %393 = vmatprep.mubr.msk.bf16.mxu0 %vm474_vm2, %v473_v22  ;;  %v150_v25 = vpack.c.bf16 %v145_v24, %v145_v24  ;;  %vm163_vm3 = vcmask 261120   ;;  %s148_s12 = scalar_lea.vmem [#allocation2], %s365_s7  ;;  %v146_v33 = vld [vmem:[#allocation4] sm:$0xf]  ;;  %s476_s14 = smov 32   ;;  %v236_v41 = vstv %s470_s11 }
  0xe2   : > { %390 = vmatpush3.bf16.msra.mxu0 %v366_v21  ;;  %s477_s15 = smov 96   ;;  %vm237_vm4 = vcmp.lt.s32.totalorder %v236_v41, %v576_v11  ;;  %s142_s11 = sadd.s32 1, %s470_s11  }
  0xe3   : > { %391 = vmatprep.subr.bf16.mxu0 %v473_v22  ;;  %p141_p1 = scmp.ge.s32.totalorder %s142_s11, %s628_s0 }
  0xe6   : > { %392 = vmatpush3.bf16.msra.mxu0 %v367_v23  ;;  %v149_v26 = vld [vmem:[%s148_s12] sm:$0xf] }
  0xe9   : > { %394 = vmatmul.mubr.msk.bf16.vlgmr.msra.gmra.mrb[0].mxu0 %vm163_vm3, %v150_v25 }
 0x1bc   : > { %v201_v27 = vpop.f32.mrb[0].mxu0 }
 0x1bd   : > { %v207_v28 = vadd.f32 %v201_v27, %v149_v26  ;;  %v395_v29 = vpop.f32.mrb[1].mxu0 }
 0x1be   : > { %v204_v30 = vpop.f32.mrb[2].mxu0 }
 0x1bf   : > { %426 = vtanh.f32 %v207_v28  ;;  %v396_v31 = vpop.f32.mrb[3].mxu0  ;;  %v369_v34 = vmul.f32 -1.442695, %v207_v28 }
 0x1c1   : > { %428 = vpow2.f32 %v369_v34 }
 0x1c9   : > { %v427_v32 = vpop.eup %426 }
 0x1ca   : > { %221 = vrot.lane.b32.xlu0 %v427_v32, %s475_s13 }
 0x1cb   : > { %v429_v35 = vpop.eup %428 }
 0x1cc   : > { %v211_v36 = vadd.f32 1.0, %v429_v35 }
 0x1ce   : > { %216 = vrot.lane.b32.xlu0 %v146_v33, %s476_s14  ;;  %430 = vrcp.f32 %v211_v36 }
 0x1d2   : > { %239 = vrot.lane.b32.xlu0 %v145_v24, %s477_s15 }
 0x1d8   : > { %v431_v37 = vpop.eup %430 }
 0x23c   : > { %v222_v38 = vpop.permute.xlu0 %221 }
 0x23d   : > { %v224_v39 = vmul.f32 %v431_v37, %v222_v38 }
 0x23f   : > { %226 = vrot.lane.b32.xlu1 %v224_v39, %s476_s14 }
 0x240   : > { %v217_v40 = vpop.permute.xlu0 %216 }
 0x241   : > { %v219_v42 = vmul.f32 %v431_v37, %v217_v40 }
 0x244   : > { %v240_v47 = vpop.permute.xlu0 %239 }
 0x2b1   : > { %v227_v43 = vpop.permute.xlu1 %226 }
 0x2b2   : > { %v229_v44 = vadd.f32 %v227_v43, %v219_v42 }
 0x2b4   : > { %432 = vtanh.f32 %v229_v44  ;;  %v248_v45 = vsel %vm237_vm4, %v229_v44, %v217_v40 }
 0x2b5   : > { %250 = vrot.lane.b32.xlu0 %v248_v45, %s477_s15 }
 0x2be   : > { %v433_v46 = vpop.eup %432 }
 0x2bf   : > { %232 = vrot.lane.b32.xlu1 %v433_v46, %s475_s13 }
 0x327   : > { %v251_v48 = vpop.permute.xlu0 %250 }
 0x328   : > { %253 = vst.msk [vmem:[#allocation4] sm:$0xf] %vm127_vm1, %v251_v48 }
 0x331   : > { %v233_v49 = vpop.permute.xlu1 %232 }
 0x332   : > { %v235_v50 = vmul.f32 %v431_v37, %v233_v49 }
 0x334   : > { %v242_v51 = vsel %vm237_vm4, %v235_v50, %v240_v47 }
 0x335   : > { %244 = vrot.lane.b32.xlu1 %v242_v51, %s476_s14 }
 0x3a2   :  { %144 = sbr.rel (!%p141_p1) target bundleno = 224 (0xe0), region = 64 }
 0x3a7   : > { %v245_v52 = vpop.permute.xlu1 %244 }
 0x3a8   : > { %247 = vst.msk [vmem:[#allocation3] sm:$0xf] %vm127_vm1, %v245_v52 }
 0x3a9 PF:  { %v434_v53 = vld [vmem:[%s636_s8] sm:$0xff]   ;;  %v478_v54 = vmov 0.0   ;;  %v435_v55 = vld [vmem:[%s636_s8 + $0x8] sm:$0xff]   ;;  %vm479_vm5 = vmmov 0   ;;  %vm279_vm6 = vcmask 261120   ;;  %vm323_vm7 = vcmask 60416  }
 0x3aa   :  { %397 = vmatprep.subr.bf16.mxu0 %v478_v54  ;;  %401 = vmatprep.mubr.msk.bf16.mxu0 %vm479_vm5, %v478_v54  ;;  %v370_v58 = vld [vmem:[%s637_s9] ss:$0 sm:$0xff]  ;;  %s480_s8 = smov [#allocation7]  }
 0x3ab   :  { %398 = vmatpush3.bf16.msra.mxu0 %v434_v53  ;;  %s343_s9 = sshll.u32 %s480_s8, 4  ;;  %s344_s9 = int_to_ptr.vmem [resolvable:$true] %s343_s9 }
 0x3ac   :  { %399 = vmatprep.subr.bf16.mxu0 %v478_v54  ;;  %s440_s22 = scalar_lea.vmem %s344_s9, 64  ;;  %p445_p3 = scmp.lt.s32.totalorder %s344_s9, %s344_s9 }
 0x3ad   :  { %p441_p2 = scmp.ne.s32.totalorder %s344_s9, %s440_s22  ;;  %p446_p4 = scmp.lt.s32.totalorder %s440_s22, %s440_s22 }
 0x3af   :  { %v254_v56 = vld [vmem:[#allocation3] sm:$0xf]  ;;  %400 = vmatpush3.bf16.msra.mxu0 %v435_v55  ;;  %p447_p5 = por %p446_p4, %p445_p3 }
 0x3b0   :  { %v255_v57 = vpack.c.bf16 %v254_v56, %v254_v56 }
 0x3b1   :  { %p448_p6 = pnand %p447_p5, %p441_p2 }
 0x3b2   :  { %402 = vmatmul.mubr.msk.bf16.vlgmr.msra.gmra.mrb[0].mxu0 %vm279_vm6, %v255_v57 }
 0x485   :  { %v317_v59 = vpop.f32.mrb[0].mxu0 }
 0x486   :  { %v318_v60 = vadd.f32 %v370_v58, %v317_v59  ;;  %v403_v61 = vpop.f32.mrb[1].mxu0 }
 0x487   :  { %v320_v62 = vpop.f32.mrb[2].mxu0 }
 0x488   :  { %v404_v63 = vpop.f32.mrb[3].mxu0  ;;  %v324_v0 = vsel %vm323_vm7, %v318_v60, -inf }
 0x489   :  { %325 = vmax.xlane.f32.xlu0 %v324_v0 }
 0x516   :  { %v326_v1 = vpop.xlane.xlu0 %325 }
 0x517   :  { %v327_v2 = vsub.f32 %v318_v60, %v326_v1 }
 0x519   :  { %v328_v3 = vmul.f32 1.442695, %v327_v2 }
 0x51b   :  { %436 = vpow2.f32 %v328_v3 }
 0x525   :  { %v437_v4 = vpop.eup %436 }
 0x526   :  { %v330_v5 = vsel %vm323_vm7, %v437_v4, 0.0 }
 0x527   :  { %331 = vadd.xlane.f32.xlu0 %v330_v5 }
 0x5b4   :  { %v332_v6 = vpop.xlane.xlu0 %331 }
 0x5b5   :  { %438 = vlog2.f32 %v332_v6 }
 0x5bf   :  { %v439_v7 = vpop.eup %438 }
 0x5c0   :  { %v334_v8 = vmul.f32 0.6931472, %v439_v7 }
 0x5c2   :  { %v335_v9 = vsub.f32 %v327_v2, %v334_v8 }
 0x5c4   :  { %336 = vst.msk [vmem:[#allocation7] sm:$0xf] %vm323_vm7, %v335_v9 }
 0x5c5   :  { %451 = shalt.err (!%p448_p6)
}
 0x5c6   :  { %s452_s24 = scalar_lea.hbm %s638_s10, 64 }
 0x5c7   :  { %p453_p7 = scmp.ne.s32.totalorder %s638_s10, %s452_s24  ;;  %p456_p8 = scmp.lt.u32.totalorder %s452_s24, %s638_s10 }
 0x5c9   :  { %p458_p9 = pnand %p456_p8, %p453_p7 }
 0x5cb   :  { %461 = shalt.err (!%p458_p9)
}
 0x5cc   :  { %346 = dma.vmem_to_hbm [thread:$0]  %s344_s9, 64, %s638_s10, [#allocation8]  }
 0x5cd   :  { %466 = dma.done.wait [#allocation8], 64  }
 0x5ce   :  { %467 = vsyncadd [#allocation8], 4294967232 }
 0x5cf   :  { %350 = vsyncpa [#allocation8], 1 }

</bundles_post_ra>
